<compile_context>
chip_gen: v5e
topology: v5e:2x2
jax: 0.10.0
libtpu: 0.0.40
codegen_flags: <defaults>
</compile_context>

<pallas_src>
import math

import jax
import jax.numpy as jnp
from jax.experimental import pallas as pl
from jax.experimental.pallas import tpu as pltpu


_VMEM_LIMIT_BYTES = 32 * 1024 * 1024      # explicit scoped-VMEM limit (safe on v5e/v6e/v7x)
_TILE_BUDGET_BYTES = 8 * 1024 * 1024      # per-tile output budget (double-buffered ~16 MiB)
_MEGACORE_SPLIT_BYTES = 2 * 1024 * 1024   # force >=2 tiles above this (v7x: 2 TCs)


def _round_up(n: int, m: int) -> int:
    return ((n + m - 1) // m) * m


def _choose_tiling(packed_rows: int, row_bytes: int, requested):
    """Returns (padded_rows, tile_rows, num_tiles)."""
    rows8 = _round_up(packed_rows, 8)
    budget_rows = max(8, (_TILE_BUDGET_BYTES // row_bytes) // 8 * 8)
    tb = min(budget_rows, rows8)
    if requested is not None:                      # optional user override only
        tb = min(tb, max(8, _round_up(int(requested), 8)))
    if rows8 * row_bytes > _MEGACORE_SPLIT_BYTES:  # let v7x use both TensorCores
        tb = min(tb, max(8, _round_up(pl.cdiv(rows8, 2), 8)))
    tb = max(8, (tb // 8) * 8)
    num_tiles = pl.cdiv(rows8, tb)
    return rows8, tb, num_tiles


def _emb_kernel_packed(x_ref, w_ref, phase_ref, o_ref):
    # x_ref: (TB, repeat) f32, w_ref: (repeat, width) f32 (0/freq selection),
    # phase_ref: (1, width) f32, o_ref: (TB, width).
    # One tiny f32 matmul expands+scales the packed timesteps lane-locally
    # (MXU slot is otherwise idle); keep f32 operands: x can be O(1e3).
    emb = jnp.dot(x_ref[...], w_ref[...], preferred_element_type=jnp.float32)
    o_ref[...] = jnp.sin(emb + phase_ref[...]).astype(o_ref.dtype)


def _emb_kernel_wide(x_ref, freqs_ref, phase_ref, o_ref):
    # x_ref: (TB, 1) f32, freqs_ref/phase_ref: (1, width) f32, o_ref: (TB, width).
    o_ref[...] = jnp.sin(x_ref[...] * freqs_ref[...] + phase_ref[...]).astype(o_ref.dtype)


def sinusoidal_pos_emb(x: jax.Array, dim: int, *, out_dtype=jnp.float32,
                       block_rows=None) -> jax.Array:
    """x: (B,) positions/timesteps -> (B, dim) sinusoidal embedding."""
    assert dim % 2 == 0 and dim >= 4, "dim must be even and >= 4"
    half_dim = dim // 2
    scale = math.log(10000.0) / (half_dim - 1)
    B = x.shape[0]

    # Pack enough timesteps per row that width = repeat*dim is a multiple of 128.
    repeat = 128 // math.gcd(dim, 128)
    width = repeat * dim

    # Hoisted per-lane constants (built once; VMEM-resident across grid steps).
    k = jnp.arange(dim, dtype=jnp.float32)
    is_cos = k >= jnp.float32(half_dim)
    j = jnp.where(is_cos, k - jnp.float32(half_dim), k)
    freqs_dim = jnp.exp(j * jnp.float32(-scale))                          # (dim,)
    phase_dim = jnp.where(is_cos, jnp.float32(math.pi / 2.0), jnp.float32(0.0))
    phase = jnp.tile(phase_dim, repeat).reshape(1, width)

    itemsize = jnp.dtype(out_dtype).itemsize
    packed_rows = pl.cdiv(B, repeat)
    rows8, tb, num_tiles = _choose_tiling(packed_rows, width * itemsize, block_rows)

    xf = x.astype(jnp.float32)
    total = rows8 * repeat
    if total != B:
        xf = jnp.pad(xf, (0, total - B))           # minimal padding; rows sliced off
    x2d = xf.reshape(rows8, repeat)

    if repeat == 1:
        kernel = _emb_kernel_wide
        const = freqs_dim.reshape(1, width)
        const_shape = (1, width)
    else:
        kernel = _emb_kernel_packed
        # W[r, c] = freqs[c % dim] if c // dim == r else 0  (kron(eye, freqs)).
        const = (jnp.eye(repeat, dtype=jnp.float32)[:, :, None]
                 * freqs_dim[None, None, :]).reshape(repeat, width)
        const_shape = (repeat, width)

    out = pl.pallas_call(
        kernel,
        out_shape=jax.ShapeDtypeStruct((rows8, width), out_dtype),
        grid=(num_tiles,),
        in_specs=[
            pl.BlockSpec((tb, repeat), lambda i: (i, 0)),
            pl.BlockSpec(const_shape, lambda i: (0, 0)),   # resident constants
            pl.BlockSpec((1, width), lambda i: (0, 0)),    # resident constants
        ],
        out_specs=pl.BlockSpec((tb, width), lambda i: (i, 0)),
        compiler_params=pltpu.CompilerParams(
            dimension_semantics=("parallel",),
            vmem_limit_bytes=_VMEM_LIMIT_BYTES,
        ),
    )(x2d, const, phase)

    # Row-major unpack back to (B, dim): same bytes, free.
    return out.reshape(rows8 * repeat, dim)[:B]


def _reference(x: jax.Array, dim: int) -> jax.Array:
    half_dim = dim // 2
    scale = math.log(10000.0) / (half_dim - 1)
    freqs = jnp.exp(jnp.arange(half_dim, dtype=jnp.float32) * -scale)
    emb = x.astype(jnp.float32)[:, None] * freqs[None, :]
    return jnp.concatenate([jnp.sin(emb), jnp.cos(emb)], axis=-1)


def _check(B: int, dim: int, key) -> None:
    x = jax.random.uniform(key, (B,), dtype=jnp.float32, minval=0.0, maxval=1000.0)
    out = jax.block_until_ready(sinusoidal_pos_emb(x, dim))
    ref = _reference(x, dim)
    assert out.shape == (B, dim), out.shape
    # cos(t) is computed as sin(t + pi/2); rounding t + pi/2 in f32 perturbs the
    # argument by <= 0.5 ulp(t) (~3e-5 at t ~ 1000) -> matching tolerance.
    assert jnp.allclose(out, ref, atol=2e-4, rtol=2e-4), f"mismatch at B={B}, dim={dim}"


if __name__ == "__main__":
    key = jax.random.PRNGKey(0)
    keys = jax.random.split(key, 6)

    _check(8, 32, keys[0])      # small primary test (repeat=4 packed, grid=1)
    _check(3000, 32, keys[1])   # minimal padding -> single 752-row tile, grid=1
    _check(20, 256, keys[2])    # repeat == 1 (dim multiple of 128) path
    _check(37, 48, keys[3])     # gcd-based packing (repeat=8), odd batch size
    _check(9000, 128, keys[4])  # >2 MiB output -> 2-tile grid (megacore split), ragged last block

    # bf16 output smoke test (halves HBM writeback / VMEM per tile).
    xb = jax.random.uniform(keys[5], (64,), dtype=jnp.float32, minval=0.0, maxval=1000.0)
    ob = jax.block_until_ready(sinusoidal_pos_emb(xb, 32, out_dtype=jnp.bfloat16))
    assert ob.shape == (64, 32) and ob.dtype == jnp.bfloat16
    assert jnp.allclose(ob.astype(jnp.float32), _reference(xb, 32), atol=1.5e-2, rtol=1.5e-2)

    print("KERNEL_OK")
</pallas_src>

<mosaic_0001>
module attributes {stable_mosaic.version = 11 : i64} {
  func.func @_emb_kernel_packed(%arg0: i32, %arg1: memref<8x4xf32, #tpu.memory_space<vmem>>, %arg2: memref<4x128xf32, #tpu.memory_space<vmem>>, %arg3: memref<1x128xf32, #tpu.memory_space<vmem>>, %arg4: memref<8x128xf32, #tpu.memory_space<vmem>>) attributes {dimension_semantics = [#tpu.dimension_semantics<parallel>], iteration_bounds = array<i64: 1>, scalar_prefetch = 0 : i64, scratch_operands = 0 : i64, tpu.core_type = #tpu.core_type<tc>, window_params = [{transform_indices = @transform_0, window_bounds = array<i64: 8, 4>}, {pipeline_mode = #tpu.pipeline_mode<synchronous>, transform_indices = @transform_1, window_bounds = array<i64: 4, 128>}, {pipeline_mode = #tpu.pipeline_mode<synchronous>, transform_indices = @transform_2, window_bounds = array<i64: 1, 128>}, {transform_indices = @transform_3, window_bounds = array<i64: 8, 128>}]} {
    %c0 = arith.constant 0 : index
    %c0_0 = arith.constant 0 : index
    %0 = vector.load %arg1[%c0, %c0_0] : memref<8x4xf32, #tpu.memory_space<vmem>>, vector<8x4xf32>
    %c0_1 = arith.constant 0 : index
    %c0_2 = arith.constant 0 : index
    %1 = vector.load %arg2[%c0_1, %c0_2] : memref<4x128xf32, #tpu.memory_space<vmem>>, vector<4x128xf32>
    %cst = arith.constant dense<0.000000e+00> : vector<8x128xf32>
    %2 = tpu.matmul %0, %1, %cst {dimension_numbers = #tpu.dot_dimension_numbers<[1], [0], [0], [1], [0, 0, 1, 1], [], []>} : vector<8x4xf32>, vector<4x128xf32>, vector<8x128xf32> -> vector<8x128xf32>
    %c0_3 = arith.constant 0 : index
    %c0_4 = arith.constant 0 : index
    %3 = vector.load %arg3[%c0_3, %c0_4] : memref<1x128xf32, #tpu.memory_space<vmem>>, vector<1x128xf32>
    %4 = vector.broadcast %3 : vector<1x128xf32> to vector<8x128xf32>
    %5 = arith.addf %2, %4 : vector<8x128xf32>
    %6 = math.sin %5 : vector<8x128xf32>
    %c0_5 = arith.constant 0 : index
    %c0_6 = arith.constant 0 : index
    %7 = vector.load %arg4[%c0_5, %c0_6] : memref<8x128xf32, #tpu.memory_space<vmem>>, vector<8x128xf32>
    tpu.vector_store %arg4[%c0_5, %c0_6], %6 {strides = array<i32>} : memref<8x128xf32, #tpu.memory_space<vmem>>, vector<8x128xf32>,
    return
  }
  func.func @transform_0(%arg0: i32) -> (i32, i32) {
    %c0_i32 = arith.constant 0 : i32
    %c0_i32_0 = arith.constant 0 : i32
    return %arg0, %c0_i32 : i32, i32
  }
  func.func @transform_1(%arg0: i32) -> (i32, i32) {
    %c0_i32 = arith.constant 0 : i32
    %c0_i32_0 = arith.constant 0 : i32
    %c0_i32_1 = arith.constant 0 : i32
    return %c0_i32, %c0_i32_0 : i32, i32
  }
  func.func @transform_2(%arg0: i32) -> (i32, i32) {
    %c0_i32 = arith.constant 0 : i32
    %c0_i32_0 = arith.constant 0 : i32
    %c0_i32_1 = arith.constant 0 : i32
    return %c0_i32, %c0_i32_0 : i32, i32
  }
  func.func @transform_3(%arg0: i32) -> (i32, i32) {
    %c0_i32 = arith.constant 0 : i32
    %c0_i32_0 = arith.constant 0 : i32
    return %arg0, %c0_i32 : i32, i32
  }
}

</mosaic_0001>

<bundles_post_ra>
// kernel: tpu_custom_call.1
= control target key start
LH: loop header
LB: loop body
LE: loop exit
PB: predicated region body
PF: predicated region fallthrough
CT: control target
= control target key end

     0   :  { %vm25_vm0 = vcmask 1043456   ;;  %vm21_vm1 = vcmask 31744   ;;  %s357_s0 = inlined_call_operand.vmem [shape: f32[8,4], index: 0, kind: input, shape index: {}]   ;;  %s358_s1 = inlined_call_operand.vmem [shape: f32[4,128], index: 1, kind: input, shape index: {}]   ;;  %s359_s2 = inlined_call_operand.vmem [shape: f32[1,128], index: 2, kind: input, shape index: {}]   ;;  %s360_s3 = inlined_call_operand.hbm [shape: f32[8,128], index: 3, kind: output, shape index: {}]  }
   0x1   :  { %v16_v0 = vld [vmem:[%s358_s1] sm:$0xf] }
   0x2   :  { %v15_v1 = vld [vmem:[%s357_s0] sm:$0xff]  ;;  %221 = vmatpush.msk.msra.mxu0 %vm25_vm0, %v16_v0 }
   0x3   :  { %8 = vsyncpa [#allocation3], 0  ;;  %222 = vmatmul.msk.f32.vlgmr.msra.gmra.mxu0 %vm21_vm1, %v15_v1  ;;  %v234_v2 = vld [vmem:[%s359_s2] ss:$0 sm:$0xff]  ;;  %v261_v16 = vmov 683565275  }
   0x4   :  { %v262_v18 = vmov 2475754826   ;;  %v263_v21 = vmov 2131351028   ;;  %v264_v24 = vmov 2102212464  }
   0x5   :  { %v265_v27 = vmov 920167782   ;;  %v266_v30 = vmov 1326507024   ;;  %v267_v0 = vmov 0   ;;  %s268_s0 = smov [#allocation2]  }
   0x6   :  { %s210_s1 = sshll.u32 %s268_s0, 4  ;;  %s212_s19 = sshll.u32 %s360_s3, 4  ;;  %s211_s1 = int_to_ptr.vmem [resolvable:$true] %s210_s1  ;;  %s213_s19 = int_to_ptr.hbm [resolvable:$true] %s212_s19 }
  0x80   :  { %v46_v3 = vpop.f32.mrf.mxu0 }
  0x81   :  { %v298_v4 = vadd.f32 %v234_v2, %v46_v3 }
  0x83   :  { %v52_v5 = vand.u32 2139095040, %v298_v4  ;;  %v49_v8 = vand.u32 2147483647, %v298_v4  ;;  %vm51_vm14 = vcmp.lt.s32.totalorder %v298_v4, 0 }
  0x85   :  { %v53_v6 = vshrl.u32 %v52_v5, 23  ;;  %v56_v10 = vand.u32 8388607, %v49_v8  ;;  %vm50_vm15 = vcmp.le.f32.partialorder %v49_v8, 0.7853982 }
  0x87   :  { %v223_v7 = vadd.s32 4294967169, %v53_v6  ;;  %v57_v14 = vor.u32 8388608, %v56_v10 }
  0x89   :  { %v59_v9 = vadd.s32 1, %v223_v7  ;;  %v315_v37 = vshll.u32 %v57_v14, 8 }
  0x8b   :  { %vm60_vm2 = vcmp.gt.s32.totalorder %v59_v9, 0  ;;  %v98_v46 = vand.u32 65535, %v315_v37  ;;  %v99_v47 = vshrl.u32 %v315_v37, 16 }
  0x8c   :  { %v61_v11 = vsel %vm60_vm2, %v59_v9, 0 }
  0x8d   :  { %v63_v12 = vand.u32 31, %v61_v11  ;;  %v306_v15 = vshrl.u32 %v61_v11, 5 }
  0x8f   :  { %v304_v13 = vsub.s32 32, %v63_v12  ;;  %v66_v17 = vshll.u32 %v261_v16, %v63_v12  ;;  %v69_v19 = vshll.u32 %v262_v18, %v63_v12  ;;  %v72_v23 = vshll.u32 %v263_v21, %v63_v12 }
  0x90   :  { %v75_v26 = vshll.u32 %v264_v24, %v63_v12  ;;  %v78_v29 = vshll.u32 %v265_v27, %v63_v12  ;;  %vm81_vm3 = vcmp.lt.s32.totalorder %v306_v15, 1  ;;  %vm84_vm4 = vcmp.lt.s32.totalorder %v306_v15, 4 }
  0x91   :  { %v67_v20 = vshrl.u32 %v262_v18, %v304_v13  ;;  %v70_v22 = vshrl.u32 %v263_v21, %v304_v13  ;;  %v73_v25 = vshrl.u32 %v264_v24, %v304_v13  ;;  %v76_v28 = vshrl.u32 %v265_v27, %v304_v13 }
  0x92   :  { %v79_v31 = vshrl.u32 %v266_v30, %v304_v13  ;;  %vm83_vm5 = vcmp.lt.s32.totalorder %v306_v15, 3  ;;  %vm82_vm6 = vcmp.lt.s32.totalorder %v306_v15, 2  ;;  %v65_v11 = vshrl.u32 %v261_v16, %v304_v13 }
  0x93   :  { %v68_v32 = vor.u32 %v67_v20, %v66_v17  ;;  %v71_v33 = vor.u32 %v70_v22, %v69_v19  ;;  %v74_v34 = vor.u32 %v73_v25, %v72_v23  ;;  %v77_v35 = vor.u32 %v76_v28, %v75_v26 }
  0x94   :  { %v80_v36 = vor.u32 %v79_v31, %v78_v29 }
  0x95   :  { %v89_v38 = vsel %vm81_vm3, %v68_v32, %v71_v33  ;;  %v93_v39 = vsel %vm81_vm3, %v71_v33, %v74_v34  ;;  %v90_v40 = vsel %vm84_vm4, %v77_v35, 920167782  ;;  %v86_v7 = vsel %vm84_vm4, %v74_v34, 2102212464 }
  0x96   :  { %v94_v41 = vsel %vm84_vm4, %v80_v36, 1326507024  ;;  %v91_v42 = vsel %vm83_vm5, %v74_v34, %v90_v40  ;;  %v85_v20 = vsel %vm81_vm3, %v65_v11, %v68_v32  ;;  %v87_v21 = vsel %vm83_vm5, %v71_v33, %v86_v7 }
  0x97   :  { %v95_v43 = vsel %vm83_vm5, %v77_v35, %v94_v41  ;;  %v92_v44 = vsel %vm82_vm6, %v89_v38, %v91_v42  ;;  %v88_v13 = vsel %vm82_vm6, %v85_v20, %v87_v21  ;;  %vm192_vm3 = vweird.f32 %v298_v4 }
  0x98   :  { %v96_v45 = vsel %vm82_vm6, %v93_v39, %v95_v43  ;;  %v122_v50 = vand.u32 65535, %v92_v44  ;;  %v123_v51 = vshrl.u32 %v92_v44, 16  ;;  %v142_v29 = vmul.u32 %v315_v37, %v88_v13 }
  0x99   :  { %v100_v48 = vand.u32 65535, %v96_v45  ;;  %v101_v49 = vshrl.u32 %v96_v45, 16 }
  0x9a   :  { %v125_v54 = vmul.u32 %v123_v51, %v98_v46  ;;  %v126_v55 = vmul.u32 %v122_v50, %v99_v47  ;;  %v124_v59 = vmul.u32 %v122_v50, %v98_v46  ;;  %v127_v63 = vmul.u32 %v123_v51, %v99_v47 }
  0x9b   :  { %v103_v52 = vmul.u32 %v101_v49, %v98_v46  ;;  %v104_v53 = vmul.u32 %v100_v48, %v99_v47  ;;  %v102_v56 = vmul.u32 %v100_v48, %v98_v46  ;;  %v105_v58 = vmul.u32 %v101_v49, %v99_v47 }
  0x9c   :  { %v128_v60 = vshll.u32 %v125_v54, 16  ;;  %v130_v2 = vshll.u32 %v126_v55, 16  ;;  %v129_v18 = vshrl.u32 %v125_v54, 16  ;;  %v131_v24 = vshrl.u32 %v126_v55, 16 }
  0x9d   :  { %v106_v57 = vshll.u32 %v103_v52, 16  ;;  %v108_v61 = vshll.u32 %v104_v53, 16  ;;  %v107_v12 = vshrl.u32 %v103_v52, 16  ;;  %v109_v22 = vshrl.u32 %v104_v53, 16 }
  0x9e   :  { %vm132_vm8 = vc.u32 %v124_v59, %v128_v60  ;;  %v134_v3 = vadd.s32 %v128_v60, %v124_v59 }
  0x9f   :  { %vm110_vm7 = vc.u32 %v102_v56, %v106_v57  ;;  %v112_v62 = vadd.s32 %v106_v57, %v102_v56  ;;  %v133_v6 = vsel %vm132_vm8, 1, %v267_v0 }
  0xa0   :  { %v111_v1 = vsel %vm110_vm7, 1, %v267_v0  ;;  %v135_v10 = vadd.s32 %v133_v6, %v127_v63  ;;  %vm136_vm10 = vc.u32 %v134_v3, %v130_v2  ;;  %v138_v27 = vadd.s32 %v134_v3, %v130_v2 }
  0xa1   :  { %v113_v5 = vadd.s32 %v111_v1, %v105_v58  ;;  %vm114_vm9 = vc.u32 %v112_v62, %v108_v61  ;;  %v137_v17 = vsel %vm136_vm10, 1, %v267_v0 }
  0xa2   :  { %v115_v9 = vsel %vm114_vm9, 1, %v267_v0  ;;  %v139_v19 = vadd.s32 %v137_v17, %v135_v10 }
  0xa3   :  { %v117_v14 = vadd.s32 %v115_v9, %v113_v5 }
  0xa4   :  { %v140_v25 = vadd.s32 %v139_v19, %v129_v18 }
  0xa5   :  { %v118_v23 = vadd.s32 %v117_v14, %v107_v12 }
  0xa6   :  { %v141_v16 = vadd.s32 %v140_v25, %v131_v24 }
  0xa7   :  { %v119_v26 = vadd.s32 %v118_v23, %v109_v22 }
  0xa8   :  { %v145_v28 = vadd.s32 1, %v141_v16 }
  0xa9   :  { %vm144_vm11 = vc.u32 %v119_v26, %v138_v27  ;;  %v143_v15 = vadd.s32 %v138_v27, %v119_v26 }
  0xaa   :  { %v146_v30 = vsel %vm144_vm11, %v145_v28, %v141_v16 }
  0xab   :  { %v147_v31 = vadd.s32 %v146_v30, %v142_v29 }
  0xad   :  { %v148_v32 = vadd.s32 536870912, %v147_v31 }
  0xaf   :  { %v149_v34 = vshrl.u32 %v148_v32, 30 }
  0xb1   :  { %v150_v35 = vshll.u32 %v149_v34, 30  ;;  %v173_v54 = vsub.s32 4, %v149_v34 }
  0xb3   :  { %v151_v33 = vsub.s32 %v147_v31, %v150_v35  ;;  %v174_v59 = vsel %vm51_vm14, %v173_v54, %v149_v34 }
  0xb4   :  { %v176_v62 = vsel %vm50_vm15, 0, %v174_v59 }
  0xb5   :  { %vm152_vm12 = vcmp.lt.s32.totalorder %v151_v33, 0  ;;  %v153_v36 = vsub.s32 0, %v151_v33  ;;  %v193_v3 = vadd.s32 3, %v176_v62 }
  0xb7   :  { %v154_v38 = vsel %vm152_vm12, %v153_v36, %v151_v33  ;;  %v194_v9 = vand.u32 3, %v193_v3 }
  0xb8   :  { %v155_v39 = vclz %v154_v38 }
  0xb9   :  { %vm196_vm0 = vcmp.eq.s32.totalorder %v194_v9, 0  ;;  %vm199_vm1 = vcmp.eq.s32.totalorder %v194_v9, 2  ;;  %vm195_vm2 = vcmp.lt.s32.totalorder %v194_v9, 2 }
  0xba   :  { %v224_v40 = vadd.s32 4294967294, %v155_v39 }
  0xbc   :  { %vm225_vm13 = vcmp.lt.s32.totalorder %v224_v40, 0 }
  0xbd   :  { %v158_v41 = vsel %vm225_vm13, 0, %v224_v40 }
  0xbe   :  { %v159_v42 = vsub.s32 32, %v158_v41  ;;  %v163_v43 = vsub.s32 4294967266, %v158_v41  ;;  %v160_v44 = vshll.u32 %v151_v33, %v158_v41 }
  0xc0   :  { %v161_v45 = vshrl.u32 %v143_v15, %v159_v42  ;;  %v164_v46 = vadd.s32 127, %v163_v43 }
  0xc2   :  { %v162_v37 = vor.u32 %v161_v45, %v160_v44  ;;  %v165_v47 = vshll.u32 %v164_v46, 23 }
  0xc4   :  { %v166_v48 = vor.u32 4788187, %v165_v47  ;;  %v169_v50 = vcvt.s32.f32 %v162_v37 }
  0xc6   :  { %v167_v49 = vand.u32 2147483647, %v166_v48 }
  0xc8   :  { %v170_v51 = vmul.f32 %v169_v50, %v167_v49 }
  0xca   :  { %v171_v52 = vxor.u32 2147483648, %v170_v51 }
  0xcc   :  { %v172_v53 = vsel %vm51_vm14, %v171_v52, %v170_v51 }
  0xcd   :  { %v175_v55 = vsel %vm50_vm15, %v298_v4, %v172_v53 }
  0xce   :  { %v177_v56 = vmul.f32 %v175_v55, %v175_v55 }
  0xd0   :  { %v178_v57 = vmul.f32 -0.001358992, %v177_v56  ;;  %v185_v58 = vmul.f32 -0.00019511016, %v177_v56 }
  0xd2   :  { %v179_v60 = vadd.f32 0.041655596, %v178_v57  ;;  %v186_v61 = vadd.f32 0.008332121, %v185_v58 }
  0xd4   :  { %v180_v63 = vmul.f32 %v179_v60, %v177_v56  ;;  %v187_v0 = vmul.f32 %v186_v61, %v177_v56 }
  0xd6   :  { %v181_v1 = vadd.f32 -0.4999988, %v180_v63  ;;  %v188_v2 = vadd.f32 -0.16666654, %v187_v0 }
  0xd8   :  { %v182_v5 = vmul.f32 %v181_v1, %v177_v56  ;;  %v189_v6 = vmul.f32 %v188_v2, %v177_v56 }
  0xda   :  { %v183_v7 = vadd.f32 1.0, %v182_v5  ;;  %v190_v8 = vadd.f32 1.0, %v189_v6 }
  0xdc   :  { %v191_v10 = vmul.f32 %v190_v8, %v175_v55  ;;  %v200_v11 = vxor.u32 2147483648, %v183_v7 }
  0xde   :  { %v197_v12 = vxor.u32 2147483648, %v191_v10  ;;  %v201_v17 = vsel %vm199_vm1, %v200_v11, %v191_v10 }
  0xe0   :  { %v198_v14 = vsel %vm196_vm0, %v183_v7, %v197_v12 }
  0xe1   :  { %v202_v18 = vsel %vm195_vm2, %v198_v14, %v201_v17 }
  0xe2   :  { %v203_v19 = vsel %vm192_vm3, nan, %v202_v18 }
  0xe3   :  { %204 = vst [vmem:[#allocation2] sm:$0xff] %v203_v19 }
  0xe4   :  { %215 = dma.vmem_to_hbm [thread:$0]  %s211_s1, 128, %s213_s19, [#allocation3]  }
  0xe5   :  { %259 = dma.done.wait [#allocation3], 128  }
  0xe6   :  { %260 = vsyncadd [#allocation3], 4294967168 }
  0xe7   :  { %220 = vsyncpa [#allocation3], 1 }

</bundles_post_ra>
